<compile_context>
chip_gen: v6e
topology: v6e:2x2x1
jax: 0.10.0
libtpu: 0.0.40
codegen_flags: <defaults>
</compile_context>

<pallas_src>
import functools

import jax
import jax.numpy as jnp
from jax import lax
from jax.experimental import pallas as pl
from jax.experimental.pallas import tpu as pltpu

EPS = 1e-5
NUM_CLASSES = 10
# (expansion, out_planes, num_blocks, stride) -- same as the PyTorch module.
CFG = [(1, 16, 1, 1), (6, 24, 2, 1), (6, 32, 3, 2), (6, 64, 4, 2),
       (6, 96, 3, 1), (6, 160, 3, 2), (6, 320, 1, 1)]
ACT_DTYPE = jnp.bfloat16
_VMEM_LIMIT = 32 * 1024 * 1024


# -----------------------------------------------------------------------------
# Static network plan (block metadata + fusion groups)
# -----------------------------------------------------------------------------

def _build_metas():
    metas = []
    cin = 32
    for expansion, cout, num_blocks, stride in CFG:
        for s in [stride] + [1] * (num_blocks - 1):
            metas.append(dict(cin=cin, cout=cout, planes=expansion * cin,
                              stride=s, has_sc=(s == 1 and cin != cout)))
            cin = cout
    return tuple(metas)


_BLOCK_METAS = _build_metas()               # 17 inverted-residual blocks
_GROUPS = (                                  # 4 fused pallas_calls total
    dict(stem=True,  head=False, blocks=(0, 1, 2)),
    dict(stem=False, head=False, blocks=(3, 4, 5, 6, 7, 8, 9)),
    dict(stem=False, head=False, blocks=(10, 11, 12, 13, 14, 15)),
    dict(stem=False, head=True,  blocks=(16,)),
)


# -----------------------------------------------------------------------------
# pltpu.roll direction probe (tiny kernel, run once, outside any jit trace)
# -----------------------------------------------------------------------------

@functools.lru_cache(maxsize=None)
def _roll_is_jnp_like():
    """True iff pltpu.roll(x, s, ax)[i] == x[i - s]  (jnp.roll semantics)."""
    def probe(x_ref, o_ref):
        o_ref[...] = pltpu.roll(x_ref[...], 1, 0)

    x = jnp.arange(8 * 128, dtype=jnp.float32).reshape(8, 128)
    out = pl.pallas_call(
        probe, out_shape=jax.ShapeDtypeStruct((8, 128), jnp.float32))(x)
    return bool(jnp.array_equal(out, jnp.roll(x, 1, 0)))


def _shift_rows(v, s, axis, size):
    """out[i] = v[(i + s) mod size] along `axis` (s, size static Python ints)."""
    s = s % size
    if s == 0:
        return v
    amount = (size - s) if _roll_is_jnp_like() else s
    return pltpu.roll(v, amount, axis)


def _conv3x3_taps(v, H, W):
    """Yield (tap_index, shifted+masked source) for a 3x3 pad-1 convolution.

    `v` is (H*W, C), row-major over (h, w).  The centre tap (index 4) is
    yielded first and unmasked so callers can initialise their accumulator
    with it.  Shifts run on the XLU (pltpu.roll); border handling uses
    hoisted per-edge iota comparisons (single compare for pure row/column
    taps, a 2-term AND for corners).
    """
    assert W > 0 and (W & (W - 1)) == 0, "W must be a power of two"
    n = H * W
    yield 4, v                                       # centre: no shift, no mask
    r = lax.broadcasted_iota(jnp.int32, (n, 1), 0)
    hh = r >> (W.bit_length() - 1)
    ww = r & (W - 1)
    edge = {(-1, 0): hh >= 1, (1, 0): hh <= H - 2,
            (0, -1): ww >= 1, (0, 1): ww <= W - 2}
    for oy in (-1, 0, 1):
        for ox in (-1, 0, 1):
            if oy == 0 and ox == 0:
                continue
            src = _shift_rows(v, oy * W + ox, 0, n)
            if oy == 0:
                valid = edge[(0, ox)]
            elif ox == 0:
                valid = edge[(oy, 0)]
            else:
                valid = edge[(oy, 0)] & edge[(0, ox)]
            yield (oy + 1) * 3 + (ox + 1), jnp.where(valid, src, 0.0)


# -----------------------------------------------------------------------------
# Fused group kernel: [stem] -> N inverted-residual blocks -> [head]
# -----------------------------------------------------------------------------

def _group_kernel(*refs, n_in, metas, has_stem, has_head, H0, W0):
    in_refs = refs[:n_in]
    out_ref = refs[n_in]
    scratch = refs[n_in + 1:]

    it = iter(in_refs)
    x_ref = next(it)
    H, W = H0, W0

    if has_stem:
        w_ref = next(it)                               # (9, 3, 32) tap-major
        bn = next(it)[...]                             # (2, 32)
        x = x_ref[...].astype(jnp.float32)             # (H*W, 3)
        acc = None
        for k, src in _conv3x3_taps(x, H, W):
            c = jnp.dot(src, w_ref[k], preferred_element_type=jnp.float32)
            acc = c if acc is None else acc + c
        cur = jnp.maximum(acc * bn[0:1, :] + bn[1:2, :], 0.0).astype(ACT_DTYPE)
    else:
        cur = x_ref[...]                               # (H*W, Cin) bf16

    si = 0
    for m in metas:
        w1_ref = next(it); bn1 = next(it)[...]
        w2_ref = next(it); bn2 = next(it)[...]
        w3_ref = next(it); bn3 = next(it)[...]
        if m["has_sc"]:
            wsc_ref = next(it); bnsc = next(it)[...]

        # 1x1 expand + BN + ReLU (MXU, f32 accumulation).
        y = jnp.dot(cur, w1_ref[...], preferred_element_type=jnp.float32)
        y = jnp.maximum(y * bn1[0:1, :] + bn1[1:2, :], 0.0)   # (H*W, planes) f32

        # 3x3 depthwise conv (pad=1): centre tap initialises the accumulator,
        # border taps use the specialized masks from _conv3x3_taps.
        dw = None
        for k, src in _conv3x3_taps(y, H, W):
            t = src * w2_ref[k:k + 1, :]
            dw = t if dw is None else dw + t
        dw = jnp.maximum(dw * bn2[0:1, :] + bn2[1:2, :], 0.0)

        if m["stride"] == 2:
            # Spatial 2x subsample BEFORE the project matmul, fully in VMEM:
            # even rows via aligned block stores into scratch, even columns
            # via one stride-2 read.
            ho, wo = H // 2, W // 2
            scr = scratch[si]
            si += 1
            for a in range(ho):
                scr[a * W:(a + 1) * W, :] = dw[2 * a * W:(2 * a + 1) * W, :]
            dw = scr[pl.ds(0, ho * wo, stride=2), :]          # (ho*wo, planes)
            H, W = ho, wo

        # 1x1 project + BN (+ fused shortcut, per PyTorch Block semantics).
        z = jnp.dot(dw.astype(ACT_DTYPE), w3_ref[...],
                    preferred_element_type=jnp.float32)
        z = z * bn3[0:1, :] + bn3[1:2, :]
        if m["stride"] == 1:
            if m["has_sc"]:
                sc = jnp.dot(cur, wsc_ref[...], preferred_element_type=jnp.float32)
                z = z + (sc * bnsc[0:1, :] + bnsc[1:2, :])
            else:
                z = z + cur.astype(jnp.float32)
        cur = z.astype(ACT_DTYPE)

    if has_head:
        wh_ref = next(it); bnh = next(it)[...]
        wl_ref = next(it); bl = next(it)[...]
        yh = jnp.dot(cur, wh_ref[...], preferred_element_type=jnp.float32)
        yh = jnp.maximum(yh * bnh[0:1, :] + bnh[1:2, :], 0.0)   # (16, 1280)
        pooled = jnp.mean(yh, axis=0, keepdims=True)            # 4x4 global avg pool
        logits = jnp.dot(pooled, wl_ref[...].astype(jnp.float32),
                         preferred_element_type=jnp.float32) + bl
        out_ref[...] = logits.astype(out_ref.dtype)
    else:
        out_ref[...] = cur


# -----------------------------------------------------------------------------
# pallas_call wrappers
# -----------------------------------------------------------------------------

def _rep_spec(arr):
    zero_idx = (0,) * arr.ndim
    return pl.BlockSpec(arr.shape, lambda i: zero_idx)


def _batched_spec(tail):
    tail = tuple(tail)
    idx = (0,) * len(tail)
    return pl.BlockSpec((None,) + tail, lambda i: (i,) + idx)


def _compiler_params():
    return pltpu.CompilerParams(dimension_semantics=("parallel",),
                                vmem_limit_bytes=_VMEM_LIMIT)


def _group_call(params, group, x3d, res):
    n = x3d.shape[0]
    metas = tuple(_BLOCK_METAS[i] for i in group["blocks"])

    arrays = [x3d]
    if group["stem"]:
        arrays += [params["conv1_w"], params["bn1"]]
    for bi in group["blocks"]:
        p = params["blocks"][bi]
        arrays += [p["w1"], p["bn1"], p["w2"], p["bn2"], p["w3"], p["bn3"]]
        if "wsc" in p:
            arrays += [p["wsc"], p["bnsc"]]
    if group["head"]:
        arrays += [params["conv2_w"], params["bn2h"], params["lin_w"],
                   params["lin_b"]]

    # One f32 scratch per stride-2 block (holds the even output rows of dw).
    scratch = []
    h = res
    for m in metas:
        if m["stride"] == 2:
            scratch.append(pltpu.VMEM(((h // 2) * h, m["planes"]), jnp.float32))
            h //= 2
    res_out = h

    if group["head"]:
        out_rows, out_c, out_dtype = 1, NUM_CLASSES, jnp.float32
    else:
        out_rows, out_c, out_dtype = res_out * res_out, metas[-1]["cout"], ACT_DTYPE

    kernel = functools.partial(
        _group_kernel, n_in=len(arrays), metas=metas,
        has_stem=group["stem"], has_head=group["head"], H0=res, W0=res)

    out = pl.pallas_call(
        kernel,
        out_shape=jax.ShapeDtypeStruct((n, out_rows, out_c), out_dtype),
        grid=(n,),
        in_specs=[_batched_spec(x3d.shape[1:])]
                 + [_rep_spec(a) for a in arrays[1:]],
        out_specs=_batched_spec((out_rows, out_c)),
        scratch_shapes=scratch,
        compiler_params=_compiler_params(),
    )(*arrays)
    return out, res_out


# -----------------------------------------------------------------------------
# Parameters (deterministic, synthetic; eval-mode BN folded into scale/shift)
# -----------------------------------------------------------------------------

class _KeyGen:
    def __init__(self, key):
        self.key = key
        self.i = 0

    def __call__(self):
        self.i += 1
        return jax.random.fold_in(self.key, self.i)


def _bn_fold(kg, c):
    gamma = 1.0 + 0.1 * jax.random.normal(kg(), (c,), jnp.float32)
    beta = 0.1 * jax.random.normal(kg(), (c,), jnp.float32)
    mean = 0.1 * jax.random.normal(kg(), (c,), jnp.float32)
    var = 1.0 + 0.1 * jnp.abs(jax.random.normal(kg(), (c,), jnp.float32))
    scale = gamma * lax.rsqrt(var + EPS)
    shift = beta - mean * scale
    return jnp.stack([scale, shift], axis=0)            # (2, c)


def _conv_w(kg, shape, fan_in, dtype):
    w = jax.random.normal(kg(), shape, jnp.float32) * jnp.sqrt(2.0 / fan_in)
    return w.astype(dtype)


def init_params(key, num_classes=NUM_CLASSES):
    kg = _KeyGen(key)
    params = {}
    params["conv1_w"] = _conv_w(kg, (9, 3, 32), 27, jnp.float32)   # tap-major stem
    params["bn1"] = _bn_fold(kg, 32)
    blocks = []
    for m in _BLOCK_METAS:
        cin, cout, planes = m["cin"], m["cout"], m["planes"]
        p = {"w1": _conv_w(kg, (cin, planes), cin, ACT_DTYPE),
             "bn1": _bn_fold(kg, planes),
             "w2": _conv_w(kg, (9, planes), 9, jnp.float32),        # depthwise taps
             "bn2": _bn_fold(kg, planes),
             "w3": _conv_w(kg, (planes, cout), planes, ACT_DTYPE),
             "bn3": _bn_fold(kg, cout)}
        if m["has_sc"]:
            p["wsc"] = _conv_w(kg, (cin, cout), cin, ACT_DTYPE)
            p["bnsc"] = _bn_fold(kg, cout)
        blocks.append(p)
    params["blocks"] = blocks
    params["conv2_w"] = _conv_w(kg, (320, 1280), 320, ACT_DTYPE)
    params["bn2h"] = _bn_fold(kg, 1280)
    params["lin_w"] = (jax.random.normal(kg(), (1280, num_classes), jnp.float32)
                       / jnp.sqrt(1280.0)).astype(ACT_DTYPE)
    params["lin_b"] = 0.01 * jax.random.normal(kg(), (1, num_classes), jnp.float32)
    return params


# -----------------------------------------------------------------------------
# Forward pass (Pallas)
# -----------------------------------------------------------------------------

def mobilenetv2_forward(params, x_nchw):
    x = jnp.transpose(x_nchw, (0, 2, 3, 1))                        # NCHW -> NHWC
    n, H, W, _ = x.shape
    assert H == 32 and W == 32, "CIFAR MobileNetV2 expects 32x32 inputs"
    cur = x.reshape(n, H * W, 3).astype(ACT_DTYPE)
    res = H
    for group in _GROUPS:
        cur, res = _group_call(params, group, cur, res)
    return cur.reshape(n, NUM_CLASSES)


# -----------------------------------------------------------------------------
# Pure-XLA reference (same dtype handling) used for a numerical cross-check
# -----------------------------------------------------------------------------

def _reference_block(p, x_nhwc, stride):
    n, H, W, cin = x_nhwc.shape
    y = jnp.dot(x_nhwc.reshape(-1, cin), p["w1"],
                preferred_element_type=jnp.float32)
    y = jnp.maximum(y * p["bn1"][0] + p["bn1"][1], 0.0)
    planes = y.shape[-1]
    y = y.reshape(n, H, W, planes)
    yp = jnp.pad(y, ((0, 0), (1, 1), (1, 1), (0, 0)))
    ho, wo = H // stride, W // stride
    acc = jnp.zeros((n, ho, wo, planes), jnp.float32)
    for dy in range(3):
        for dx in range(3):
            acc = acc + (yp[:, dy:dy + H:stride, dx:dx + W:stride, :]
                         * p["w2"][dy * 3 + dx])
    dw = jnp.maximum(acc * p["bn2"][0] + p["bn2"][1], 0.0)
    z = jnp.dot(dw.reshape(-1, planes).astype(ACT_DTYPE), p["w3"],
                preferred_element_type=jnp.float32)
    z = z * p["bn3"][0] + p["bn3"][1]
    if stride == 1:
        if "wsc" in p:
            sc = jnp.dot(x_nhwc.reshape(-1, cin), p["wsc"],
                         preferred_element_type=jnp.float32)
            sc = sc * p["bnsc"][0] + p["bnsc"][1]
        else:
            sc = x_nhwc.reshape(-1, cin).astype(jnp.float32)
        z = z + sc
    return z.astype(ACT_DTYPE).reshape(n, ho, wo, z.shape[-1])


def reference_forward(params, x_nchw):
    x = jnp.transpose(x_nchw, (0, 2, 3, 1)).astype(ACT_DTYPE)
    n, H, W, _ = x.shape
    xf = x.astype(jnp.float32)
    xp = jnp.pad(xf, ((0, 0), (1, 1), (1, 1), (0, 0)))
    acc = jnp.zeros((n, H, W, 32), jnp.float32)
    for dy in range(3):
        for dx in range(3):
            acc = acc + xp[:, dy:dy + H, dx:dx + W, :] @ params["conv1_w"][dy * 3 + dx]
    out = jnp.maximum(acc * params["bn1"][0] + params["bn1"][1], 0.0).astype(ACT_DTYPE)
    for bi, m in enumerate(_BLOCK_METAS):
        out = _reference_block(params["blocks"][bi], out, m["stride"])
    n2, h2, w2, c2 = out.shape
    y = jnp.dot(out.reshape(-1, c2), params["conv2_w"],
                preferred_element_type=jnp.float32)
    y = jnp.maximum(y * params["bn2h"][0] + params["bn2h"][1], 0.0)
    pooled = jnp.mean(y.reshape(n2, h2 * w2, -1), axis=1)
    return jnp.dot(pooled, params["lin_w"].astype(jnp.float32)) + params["lin_b"]


# -----------------------------------------------------------------------------
# Main
# -----------------------------------------------------------------------------

if __name__ == "__main__":
    key = jax.random.PRNGKey(0)
    pkey, xkey = jax.random.split(key)
    params = init_params(pkey, NUM_CLASSES)
    # CIFAR-shaped input (batch=2, 3 channels, 32x32).
    x = jax.random.normal(xkey, (2, 3, 32, 32), jnp.float32)

    _ = _roll_is_jnp_like()  # run the roll-direction probe once, outside jit

    fwd = jax.jit(mobilenetv2_forward)
    logits = jax.block_until_ready(fwd(params, x))
    assert logits.shape == (2, NUM_CLASSES), logits.shape
    assert bool(jnp.all(jnp.isfinite(logits)))

    # Cross-check against a pure-XLA reference with identical dtype handling.
    ref = jax.block_until_ready(jax.jit(reference_forward)(params, x))
    err = float(jnp.max(jnp.abs(logits - ref)))
    tol = 2e-2 * (1.0 + float(jnp.max(jnp.abs(ref))))
    assert err <= tol, (err, tol)

    print("KERNEL_OK")
</pallas_src>

<mosaic_0001>
module attributes {stable_mosaic.version = 11 : i64} {
  func.func @probe(%arg0: memref<8x128xf32, #tpu.memory_space<vmem>>, %arg1: memref<8x128xf32, #tpu.memory_space<vmem>>) attributes {dimension_semantics = [], scalar_prefetch = 0 : i64, scratch_operands = 0 : i64, tpu.core_type = #tpu.core_type<tc>} {
    %c0 = arith.constant 0 : index
    %c0_0 = arith.constant 0 : index
    %0 = vector.load %arg0[%c0, %c0_0] : memref<8x128xf32, #tpu.memory_space<vmem>>, vector<8x128xf32>
    %c1_i32 = arith.constant 1 : i32
    %1 = tpu.dynamic_rotate %0 by %c1_i32 dim 0 : vector<8x128xf32>, i32 -> vector<8x128xf32>
    %c0_1 = arith.constant 0 : index
    %c0_2 = arith.constant 0 : index
    %2 = vector.load %arg1[%c0_1, %c0_2] : memref<8x128xf32, #tpu.memory_space<vmem>>, vector<8x128xf32>
    tpu.vector_store %arg1[%c0_1, %c0_2], %1 {strides = array<i32>} : memref<8x128xf32, #tpu.memory_space<vmem>>, vector<8x128xf32>,
    return
  }
}

</mosaic_0001>

<bundles_post_ra>
// kernel: tpu_custom_call.1
= control target key start
LH: loop header
LB: loop body
LE: loop exit
PB: predicated region body
PF: predicated region fallthrough
CT: control target
= control target key end

     0   :  { %6 = vsyncpa [#allocation3], 0  ;;  %s103_s0 = inlined_call_operand.hbm [shape: f32[8,128], index: 0, kind: input, shape index: {}]   ;;  %s104_s1 = inlined_call_operand.hbm [shape: f32[8,128], index: 1, kind: output, shape index: {}]  }
   0x1   :  { %7 = vsyncpa [#allocation4], 0  ;;  %s85_s6 = smov [#allocation2]  }
   0x2   :  { %s14_s7 = sshll.u32 %s85_s6, 4  ;;  %s15_s7 = int_to_ptr.vmem [resolvable:$true] %s14_s7 }
   0x3   :  { %s49_s8 = scalar_lea.vmem %s15_s7, 128  ;;  %p54_p1 = scmp.lt.s32.totalorder %s15_s7, %s15_s7 }
   0x4   :  { %p50_p0 = scmp.ne.s32.totalorder %s15_s7, %s49_s8  ;;  %p55_p2 = scmp.lt.s32.totalorder %s49_s8, %s49_s8 }
   0x6   :  { %p56_p3 = por %p55_p2, %p54_p1 }
   0x8   :  { %p57_p4 = pnand %p56_p3, %p50_p0 }
   0xa   :  { %60 = shalt.err (!%p57_p4)
}
   0xb   :  { %17 = dma.hbm_to_vmem [thread:$0]  %s103_s0, 128, %s15_s7, [#allocation3]  }
   0xc   :  { %81 = dma.done.wait [#allocation3], 128  }
   0xd   :  { %82 = vsyncadd [#allocation3], 4294967168  ;;  %s86_s11 = smov [#allocation5]   ;;  %v21_v0 = vld [vmem:[#allocation2] sm:$0xff] }
   0xe   :  { %s30_s12 = sshll.u32 %s86_s11, 4  ;;  %v22_v1 = vrot.slane %v21_v0, 7  ;;  %s31_s12 = int_to_ptr.vmem [resolvable:$true] %s30_s12 }
   0xf   :  { %s61_s13 = scalar_lea.vmem %s31_s12, 128  ;;  %p66_p6 = scmp.lt.s32.totalorder %s31_s12, %s31_s12 }
  0x10   :  { %23 = vst [vmem:[#allocation5] sm:$0xff] %v22_v1  ;;  %p62_p5 = scmp.ne.s32.totalorder %s31_s12, %s61_s13  ;;  %p67_p7 = scmp.lt.s32.totalorder %s61_s13, %s61_s13 }
  0x12   :  { %p68_p8 = por %p67_p7, %p66_p6 }
  0x14   :  { %p69_p9 = pnand %p68_p8, %p62_p5 }
  0x16   :  { %72 = shalt.err (!%p69_p9)
}
  0x17   :  { %33 = dma.vmem_to_hbm [thread:$0]  %s31_s12, 128, %s104_s1, [#allocation4]  }
  0x18   :  { %83 = dma.done.wait [#allocation4], 128  }
  0x19   :  { %84 = vsyncadd [#allocation4], 4294967168 }
  0x1a   :  { %37 = vsyncpa [#allocation3], 1 }
  0x1b   :  { %38 = vsyncpa [#allocation4], 1 }

</bundles_post_ra>
